<compile_context>
chip_gen: v7x
topology: tpu7x:2x2x1
jax: 0.10.0
libtpu: 0.0.40
codegen_flags: <defaults>
</compile_context>

<pallas_src>
import functools

import jax
import jax.numpy as jnp
import numpy as np
from jax.experimental import pallas as pl
from jax.experimental.pallas import tpu as pltpu


def _lstm_step(gates_x, h, c, whh, hidden):
    """One LSTM step. Gate column order is [g, i, f, o] (reordered in wrapper)."""
    H = hidden
    gates = gates_x + jnp.dot(h, whh, preferred_element_type=jnp.float32)
    # cell gate occupies lanes 0:H -> prefix slice (lane-aligned, cheap)
    g_g = jnp.tanh(gates[:, 0:H])
    # one full-vreg sigmoid pass covers the three sigmoid gates
    sig = jax.nn.sigmoid(gates)
    i_g = sig[:, 1 * H:2 * H]
    f_g = sig[:, 2 * H:3 * H]
    o_g = sig[:, 3 * H:4 * H]
    c_new = f_g * c + i_g * g_g
    h_new = o_g * jnp.tanh(c_new)
    return h_new, c_new


def _lstm_regr_kernel_small(x_ref, wih_ref, whh_ref, b_ref, wfc_ref, bfc_ref,
                            out_ref, *, seq_len, batch, hidden):
    """Small L*B: keep gx in vregs, fully static unrolled time loop."""
    B, H = batch, hidden

    # Input projection for ALL timesteps, bias folded in once. Stays in vregs.
    gx = (jnp.dot(x_ref[...], wih_ref[...], preferred_element_type=jnp.float32)
          + b_ref[...])

    whh = whh_ref[...]                                   # hoisted weight load

    h = jnp.zeros((B, H), jnp.float32)
    c = jnp.zeros((B, H), jnp.float32)
    for t in range(seq_len):                             # static slices only
        h, c = _lstm_step(gx[t * B:(t + 1) * B, :], h, c, whh, H)

    # Final FC, lane-padded output (single unmasked store).
    out_ref[...] = (
        jnp.dot(h, wfc_ref[...], preferred_element_type=jnp.float32)
        + bfc_ref[...])


def _lstm_regr_kernel_large(x_ref, wih_ref, whh_ref, b_ref, wfc_ref, bfc_ref,
                            out_ref, gx_ref, *, seq_len, batch, hidden, unroll):
    """Large L*B fallback: gx staged through a VMEM scratch, bounded unroll."""
    B, H = batch, hidden

    gx_ref[...] = (
        jnp.dot(x_ref[...], wih_ref[...], preferred_element_type=jnp.float32)
        + b_ref[...])

    whh = whh_ref[...]

    def step(t, carry):
        h, c = carry
        row = pl.multiple_of(t * B, 8)                   # sublane-aligned slice
        return _lstm_step(gx_ref[pl.ds(row, B), :], h, c, whh, H)

    h0 = jnp.zeros((B, H), jnp.float32)
    c0 = jnp.zeros((B, H), jnp.float32)
    h_last, _ = jax.lax.fori_loop(0, seq_len, step, (h0, c0), unroll=unroll)

    out_ref[...] = (
        jnp.dot(h_last, wfc_ref[...], preferred_element_type=jnp.float32)
        + bfc_ref[...])


def lstm_regr_forward(input_ids, params):
    """Forward pass matching LSTM_regr.forward (dropout is eval-mode identity)."""
    emb = params["embedding"]              # (V, E), row 0 zeros (padding_idx=0)
    w_ih_t = params["w_ih_t"]              # (E, 4H)  PyTorch gate order [i,f,g,o]
    w_hh_t = params["w_hh_t"]              # (H, 4H)
    b_gates = params["b_gates"]            # (1, 4H)
    w_fc_t = params["w_fc_t"]              # (H, 6)
    b_fc = params["b_fc"]                  # (1, 6)

    B, L = input_ids.shape
    E = emb.shape[1]
    H = w_hh_t.shape[0]
    F = w_fc_t.shape[1]

    B_pad = max(8, -(-B // 8) * 8)         # f32 sublane alignment
    F_pad = max(128, -(-F // 128) * 128)   # lane-dense output width

    # Pad the batch with padding-token rows (token 0 -> zero embedding row);
    # pad rows never mix with real rows and are sliced away afterwards.
    ids = jnp.zeros((B_pad, L), input_ids.dtype).at[:B, :].set(input_ids)

    # Embedding gather (plain JAX glue) in time-major order, flattened so the
    # kernel prologue does one big input-projection matmul.
    # Dropout(p=0.4) is the identity in eval mode; no-op here.
    x_flat = emb[ids.T].reshape(L * B_pad, E)            # (L*B_pad, E)

    # Reorder gate columns [i, f, g, o] -> [g, i, f, o] so the tanh gate is a
    # lane-aligned prefix slice in the kernel (done once, outside the kernel).
    def _reorder(w):
        return jnp.concatenate(
            [w[..., 2 * H:3 * H], w[..., 0:H], w[..., H:2 * H], w[..., 3 * H:4 * H]],
            axis=-1)

    w_ih_k = _reorder(w_ih_t)
    w_hh_k = _reorder(w_hh_t)
    b_g_k = _reorder(b_gates)

    # Lane-pad the tiny FC weights so the kernel's output store is lane-dense.
    w_fc_pad = jnp.zeros((H, F_pad), jnp.float32).at[:, :F].set(w_fc_t)
    b_fc_pad = jnp.zeros((1, F_pad), jnp.float32).at[:, :F].set(b_fc)

    gx_bytes = L * B_pad * 4 * H * 4
    small = gx_bytes <= 16 * 4096          # gx fits in <= 16 vregs

    if small:
        kernel = functools.partial(_lstm_regr_kernel_small,
                                   seq_len=L, batch=B_pad, hidden=H)
        scratch_shapes = []
    else:
        unroll = True if L <= 16 else 8    # bounded unroll for long sequences
        kernel = functools.partial(_lstm_regr_kernel_large,
                                   seq_len=L, batch=B_pad, hidden=H,
                                   unroll=unroll)
        scratch_shapes = [pltpu.VMEM((L * B_pad, 4 * H), jnp.float32)]

    vmem_spec = pl.BlockSpec(memory_space=pltpu.MemorySpace.VMEM)
    out_pad = pl.pallas_call(
        kernel,
        out_shape=jax.ShapeDtypeStruct((B_pad, F_pad), jnp.float32),
        in_specs=[vmem_spec] * 6,
        out_specs=vmem_spec,
        scratch_shapes=scratch_shapes,
    )(x_flat, w_ih_k, w_hh_k, b_g_k, w_fc_pad, b_fc_pad)

    return out_pad[:B, :F]


def lstm_regr_reference(input_ids, params):
    """Pure-JAX reference (lax.scan, PyTorch gate order) for correctness."""
    emb = params["embedding"]
    x = emb[input_ids]                     # (B, L, E)
    B, L, E = x.shape
    H = params["w_hh_t"].shape[0]

    def step(carry, x_t):
        h, c = carry
        gates = (x_t @ params["w_ih_t"] + params["b_gates"]) + h @ params["w_hh_t"]
        i_g = jax.nn.sigmoid(gates[:, 0 * H:1 * H])
        f_g = jax.nn.sigmoid(gates[:, 1 * H:2 * H])
        g_g = jnp.tanh(gates[:, 2 * H:3 * H])
        o_g = jax.nn.sigmoid(gates[:, 3 * H:4 * H])
        c_new = f_g * c + i_g * g_g
        h_new = o_g * jnp.tanh(c_new)
        return (h_new, c_new), None

    h0 = jnp.zeros((B, H), jnp.float32)
    c0 = jnp.zeros((B, H), jnp.float32)
    (h_last, _), _ = jax.lax.scan(step, (h0, c0), jnp.transpose(x, (1, 0, 2)))
    return h_last @ params["w_fc_t"] + params["b_fc"]


def init_params(key, vocab_size, embedding_dim, hidden_dim):
    ks = jax.random.split(key, 6)
    scale = 1.0 / np.sqrt(hidden_dim)

    embedding = 0.1 * jax.random.normal(ks[0], (vocab_size, embedding_dim),
                                        jnp.float32)
    # padding_idx=0 -> embedding row 0 is zeros
    embedding = embedding.at[0].set(0.0)

    w_ih = jax.random.uniform(ks[1], (4 * hidden_dim, embedding_dim),
                              jnp.float32, -scale, scale)
    w_hh = jax.random.uniform(ks[2], (4 * hidden_dim, hidden_dim),
                              jnp.float32, -scale, scale)
    b_ih = jax.random.uniform(ks[3], (4 * hidden_dim,), jnp.float32, -scale, scale)
    b_hh = jax.random.uniform(ks[4], (4 * hidden_dim,), jnp.float32, -scale, scale)

    w_fc = jax.random.uniform(ks[5], (6, hidden_dim), jnp.float32, -scale, scale)
    b_fc = jnp.zeros((6,), jnp.float32)

    return {
        "embedding": embedding,
        "w_ih_t": w_ih.T,                              # (E, 4H)
        "w_hh_t": w_hh.T,                              # (H, 4H)
        "b_gates": (b_ih + b_hh)[None, :],             # (1, 4H)
        "w_fc_t": w_fc.T,                              # (H, 6)
        "b_fc": b_fc[None, :],                         # (1, 6)
    }


if __name__ == "__main__":
    VOCAB, EMB, HID = 50, 16, 32
    B = 2

    key = jax.random.PRNGKey(0)
    k_ids, k_ids2, k_params = jax.random.split(key, 3)
    params = init_params(k_params, VOCAB, EMB, HID)

    # --- small-L path (gx kept in vregs, static unrolled loop) -------------
    L = 8
    input_ids = jax.random.randint(k_ids, (B, L), 0, VOCAB, dtype=jnp.int32)
    input_ids = input_ids.at[0, -1].set(0).at[1, -2].set(0)   # exercise padding_idx=0

    out = jax.block_until_ready(lstm_regr_forward(input_ids, params))
    ref = jax.block_until_ready(lstm_regr_reference(input_ids, params))
    assert out.shape == (B, 6)
    assert np.allclose(np.asarray(out), np.asarray(ref), atol=1e-5, rtol=1e-5)

    # --- long-L fallback path (VMEM gx scratch, bounded unroll) ------------
    L2 = 32
    input_ids2 = jax.random.randint(k_ids2, (B, L2), 0, VOCAB, dtype=jnp.int32)
    input_ids2 = input_ids2.at[0, 0].set(0).at[1, 5].set(0)

    out2 = jax.block_until_ready(lstm_regr_forward(input_ids2, params))
    ref2 = jax.block_until_ready(lstm_regr_reference(input_ids2, params))
    assert out2.shape == (B, 6)
    assert np.allclose(np.asarray(out2), np.asarray(ref2), atol=1e-5, rtol=1e-5)

    print("KERNEL_OK")
</pallas_src>

<mosaic_0001>
module attributes {stable_mosaic.version = 11 : i64} {
  func.func @_lstm_regr_kernel_small(%arg0: memref<64x16xf32, #tpu.memory_space<vmem>>, %arg1: memref<16x128xf32, #tpu.memory_space<vmem>>, %arg2: memref<32x128xf32, #tpu.memory_space<vmem>>, %arg3: memref<1x128xf32, #tpu.memory_space<vmem>>, %arg4: memref<32x128xf32, #tpu.memory_space<vmem>>, %arg5: memref<1x128xf32, #tpu.memory_space<vmem>>, %arg6: memref<8x128xf32, #tpu.memory_space<vmem>>) attributes {dimension_semantics = [], scalar_prefetch = 0 : i64, scratch_operands = 0 : i64, tpu.core_type = #tpu.core_type<tc>} {
    %c0 = arith.constant 0 : index
    %c0_0 = arith.constant 0 : index
    %0 = vector.load %arg0[%c0, %c0_0] : memref<64x16xf32, #tpu.memory_space<vmem>>, vector<64x16xf32>
    %c0_1 = arith.constant 0 : index
    %c0_2 = arith.constant 0 : index
    %1 = vector.load %arg1[%c0_1, %c0_2] : memref<16x128xf32, #tpu.memory_space<vmem>>, vector<16x128xf32>
    %cst = arith.constant dense<0.000000e+00> : vector<64x128xf32>
    %2 = tpu.matmul %0, %1, %cst {dimension_numbers = #tpu.dot_dimension_numbers<[1], [0], [0], [1], [0, 0, 1, 1], [], []>} : vector<64x16xf32>, vector<16x128xf32>, vector<64x128xf32> -> vector<64x128xf32>
    %c0_3 = arith.constant 0 : index
    %c0_4 = arith.constant 0 : index
    %3 = vector.load %arg3[%c0_3, %c0_4] : memref<1x128xf32, #tpu.memory_space<vmem>>, vector<1x128xf32>
    %4 = vector.broadcast %3 : vector<1x128xf32> to vector<64x128xf32>
    %5 = arith.addf %2, %4 : vector<64x128xf32>
    %c0_5 = arith.constant 0 : index
    %c0_6 = arith.constant 0 : index
    %6 = vector.load %arg2[%c0_5, %c0_6] : memref<32x128xf32, #tpu.memory_space<vmem>>, vector<32x128xf32>
    %cst_7 = arith.constant 0.000000e+00 : f32
    %7 = vector.broadcast %cst_7 : f32 to vector<8x32xf32>
    %cst_8 = arith.constant 0.000000e+00 : f32
    %8 = vector.broadcast %cst_8 : f32 to vector<8x32xf32>
    %9 = vector.extract_strided_slice %5 {offsets = [0, 0], sizes = [8, 128], strides = [1, 1]} : vector<64x128xf32> to vector<8x128xf32>
    %cst_9 = arith.constant dense<0.000000e+00> : vector<8x128xf32>
    %10 = tpu.matmul %7, %6, %cst_9 {dimension_numbers = #tpu.dot_dimension_numbers<[1], [0], [0], [1], [0, 0, 1, 1], [], []>} : vector<8x32xf32>, vector<32x128xf32>, vector<8x128xf32> -> vector<8x128xf32>
    %11 = arith.addf %9, %10 : vector<8x128xf32>
    %12 = vector.extract_strided_slice %11 {offsets = [0, 0], sizes = [8, 32], strides = [1, 1]} : vector<8x128xf32> to vector<8x32xf32>
    %13 = math.tanh %12 : vector<8x32xf32>
    %14 = arith.negf %11 : vector<8x128xf32>
    %15 = math.exp %14 : vector<8x128xf32>
    %cst_10 = arith.constant 1.000000e+00 : f32
    %16 = vector.broadcast %cst_10 : f32 to vector<8x128xf32>
    %17 = arith.addf %16, %15 : vector<8x128xf32>
    %18 = arith.divf %16, %17 : vector<8x128xf32>
    %19 = vector.extract_strided_slice %18 {offsets = [0, 32], sizes = [8, 32], strides = [1, 1]} : vector<8x128xf32> to vector<8x32xf32>
    %20 = vector.extract_strided_slice %18 {offsets = [0, 64], sizes = [8, 32], strides = [1, 1]} : vector<8x128xf32> to vector<8x32xf32>
    %21 = vector.extract_strided_slice %18 {offsets = [0, 96], sizes = [8, 32], strides = [1, 1]} : vector<8x128xf32> to vector<8x32xf32>
    %22 = arith.mulf %20, %8 : vector<8x32xf32>
    %23 = arith.mulf %19, %13 : vector<8x32xf32>
    %24 = arith.addf %22, %23 : vector<8x32xf32>
    %25 = math.tanh %24 : vector<8x32xf32>
    %26 = arith.mulf %21, %25 : vector<8x32xf32>
    %27 = vector.extract_strided_slice %5 {offsets = [8, 0], sizes = [8, 128], strides = [1, 1]} : vector<64x128xf32> to vector<8x128xf32>
    %cst_11 = arith.constant dense<0.000000e+00> : vector<8x128xf32>
    %28 = tpu.matmul %26, %6, %cst_11 {dimension_numbers = #tpu.dot_dimension_numbers<[1], [0], [0], [1], [0, 0, 1, 1], [], []>} : vector<8x32xf32>, vector<32x128xf32>, vector<8x128xf32> -> vector<8x128xf32>
    %29 = arith.addf %27, %28 : vector<8x128xf32>
    %30 = vector.extract_strided_slice %29 {offsets = [0, 0], sizes = [8, 32], strides = [1, 1]} : vector<8x128xf32> to vector<8x32xf32>
    %31 = math.tanh %30 : vector<8x32xf32>
    %32 = arith.negf %29 : vector<8x128xf32>
    %33 = math.exp %32 : vector<8x128xf32>
    %cst_12 = arith.constant 1.000000e+00 : f32
    %34 = vector.broadcast %cst_12 : f32 to vector<8x128xf32>
    %35 = arith.addf %34, %33 : vector<8x128xf32>
    %36 = arith.divf %34, %35 : vector<8x128xf32>
    %37 = vector.extract_strided_slice %36 {offsets = [0, 32], sizes = [8, 32], strides = [1, 1]} : vector<8x128xf32> to vector<8x32xf32>
    %38 = vector.extract_strided_slice %36 {offsets = [0, 64], sizes = [8, 32], strides = [1, 1]} : vector<8x128xf32> to vector<8x32xf32>
    %39 = vector.extract_strided_slice %36 {offsets = [0, 96], sizes = [8, 32], strides = [1, 1]} : vector<8x128xf32> to vector<8x32xf32>
    %40 = arith.mulf %38, %24 : vector<8x32xf32>
    %41 = arith.mulf %37, %31 : vector<8x32xf32>
    %42 = arith.addf %40, %41 : vector<8x32xf32>
    %43 = math.tanh %42 : vector<8x32xf32>
    %44 = arith.mulf %39, %43 : vector<8x32xf32>
    %45 = vector.extract_strided_slice %5 {offsets = [16, 0], sizes = [8, 128], strides = [1, 1]} : vector<64x128xf32> to vector<8x128xf32>
    %cst_13 = arith.constant dense<0.000000e+00> : vector<8x128xf32>
    %46 = tpu.matmul %44, %6, %cst_13 {dimension_numbers = #tpu.dot_dimension_numbers<[1], [0], [0], [1], [0, 0, 1, 1], [], []>} : vector<8x32xf32>, vector<32x128xf32>, vector<8x128xf32> -> vector<8x128xf32>
    %47 = arith.addf %45, %46 : vector<8x128xf32>
    %48 = vector.extract_strided_slice %47 {offsets = [0, 0], sizes = [8, 32], strides = [1, 1]} : vector<8x128xf32> to vector<8x32xf32>
    %49 = math.tanh %48 : vector<8x32xf32>
    %50 = arith.negf %47 : vector<8x128xf32>
    %51 = math.exp %50 : vector<8x128xf32>
    %cst_14 = arith.constant 1.000000e+00 : f32
    %52 = vector.broadcast %cst_14 : f32 to vector<8x128xf32>
    %53 = arith.addf %52, %51 : vector<8x128xf32>
    %54 = arith.divf %52, %53 : vector<8x128xf32>
    %55 = vector.extract_strided_slice %54 {offsets = [0, 32], sizes = [8, 32], strides = [1, 1]} : vector<8x128xf32> to vector<8x32xf32>
    %56 = vector.extract_strided_slice %54 {offsets = [0, 64], sizes = [8, 32], strides = [1, 1]} : vector<8x128xf32> to vector<8x32xf32>
    %57 = vector.extract_strided_slice %54 {offsets = [0, 96], sizes = [8, 32], strides = [1, 1]} : vector<8x128xf32> to vector<8x32xf32>
    %58 = arith.mulf %56, %42 : vector<8x32xf32>
    %59 = arith.mulf %55, %49 : vector<8x32xf32>
    %60 = arith.addf %58, %59 : vector<8x32xf32>
    %61 = math.tanh %60 : vector<8x32xf32>
    %62 = arith.mulf %57, %61 : vector<8x32xf32>
    %63 = vector.extract_strided_slice %5 {offsets = [24, 0], sizes = [8, 128], strides = [1, 1]} : vector<64x128xf32> to vector<8x128xf32>
    %cst_15 = arith.constant dense<0.000000e+00> : vector<8x128xf32>
    %64 = tpu.matmul %62, %6, %cst_15 {dimension_numbers = #tpu.dot_dimension_numbers<[1], [0], [0], [1], [0, 0, 1, 1], [], []>} : vector<8x32xf32>, vector<32x128xf32>, vector<8x128xf32> -> vector<8x128xf32>
    %65 = arith.addf %63, %64 : vector<8x128xf32>
    %66 = vector.extract_strided_slice %65 {offsets = [0, 0], sizes = [8, 32], strides = [1, 1]} : vector<8x128xf32> to vector<8x32xf32>
    %67 = math.tanh %66 : vector<8x32xf32>
    %68 = arith.negf %65 : vector<8x128xf32>
    %69 = math.exp %68 : vector<8x128xf32>
    %cst_16 = arith.constant 1.000000e+00 : f32
    %70 = vector.broadcast %cst_16 : f32 to vector<8x128xf32>
    %71 = arith.addf %70, %69 : vector<8x128xf32>
    %72 = arith.divf %70, %71 : vector<8x128xf32>
    %73 = vector.extract_strided_slice %72 {offsets = [0, 32], sizes = [8, 32], strides = [1, 1]} : vector<8x128xf32> to vector<8x32xf32>
    %74 = vector.extract_strided_slice %72 {offsets = [0, 64], sizes = [8, 32], strides = [1, 1]} : vector<8x128xf32> to vector<8x32xf32>
    %75 = vector.extract_strided_slice %72 {offsets = [0, 96], sizes = [8, 32], strides = [1, 1]} : vector<8x128xf32> to vector<8x32xf32>
    %76 = arith.mulf %74, %60 : vector<8x32xf32>
    %77 = arith.mulf %73, %67 : vector<8x32xf32>
    %78 = arith.addf %76, %77 : vector<8x32xf32>
    %79 = math.tanh %78 : vector<8x32xf32>
    %80 = arith.mulf %75, %79 : vector<8x32xf32>
    %81 = vector.extract_strided_slice %5 {offsets = [32, 0], sizes = [8, 128], strides = [1, 1]} : vector<64x128xf32> to vector<8x128xf32>
    %cst_17 = arith.constant dense<0.000000e+00> : vector<8x128xf32>
    %82 = tpu.matmul %80, %6, %cst_17 {dimension_numbers = #tpu.dot_dimension_numbers<[1], [0], [0], [1], [0, 0, 1, 1], [], []>} : vector<8x32xf32>, vector<32x128xf32>, vector<8x128xf32> -> vector<8x128xf32>
    %83 = arith.addf %81, %82 : vector<8x128xf32>
    %84 = vector.extract_strided_slice %83 {offsets = [0, 0], sizes = [8, 32], strides = [1, 1]} : vector<8x128xf32> to vector<8x32xf32>
    %85 = math.tanh %84 : vector<8x32xf32>
    %86 = arith.negf %83 : vector<8x128xf32>
    %87 = math.exp %86 : vector<8x128xf32>
    %cst_18 = arith.constant 1.000000e+00 : f32
    %88 = vector.broadcast %cst_18 : f32 to vector<8x128xf32>
    %89 = arith.addf %88, %87 : vector<8x128xf32>
    %90 = arith.divf %88, %89 : vector<8x128xf32>
    %91 = vector.extract_strided_slice %90 {offsets = [0, 32], sizes = [8, 32], strides = [1, 1]} : vector<8x128xf32> to vector<8x32xf32>
    %92 = vector.extract_strided_slice %90 {offsets = [0, 64], sizes = [8, 32], strides = [1, 1]} : vector<8x128xf32> to vector<8x32xf32>
    %93 = vector.extract_strided_slice %90 {offsets = [0, 96], sizes = [8, 32], strides = [1, 1]} : vector<8x128xf32> to vector<8x32xf32>
    %94 = arith.mulf %92, %78 : vector<8x32xf32>
    %95 = arith.mulf %91, %85 : vector<8x32xf32>
    %96 = arith.addf %94, %95 : vector<8x32xf32>
    %97 = math.tanh %96 : vector<8x32xf32>
    %98 = arith.mulf %93, %97 : vector<8x32xf32>
    %99 = vector.extract_strided_slice %5 {offsets = [40, 0], sizes = [8, 128], strides = [1, 1]} : vector<64x128xf32> to vector<8x128xf32>
    %cst_19 = arith.constant dense<0.000000e+00> : vector<8x128xf32>
    %100 = tpu.matmul %98, %6, %cst_19 {dimension_numbers = #tpu.dot_dimension_numbers<[1], [0], [0], [1], [0, 0, 1, 1], [], []>} : vector<8x32xf32>, vector<32x128xf32>, vector<8x128xf32> -> vector<8x128xf32>
    %101 = arith.addf %99, %100 : vector<8x128xf32>
    %102 = vector.extract_strided_slice %101 {offsets = [0, 0], sizes = [8, 32], strides = [1, 1]} : vector<8x128xf32> to vector<8x32xf32>
    %103 = math.tanh %102 : vector<8x32xf32>
    %104 = arith.negf %101 : vector<8x128xf32>
    %105 = math.exp %104 : vector<8x128xf32>
    %cst_20 = arith.constant 1.000000e+00 : f32
    %106 = vector.broadcast %cst_20 : f32 to vector<8x128xf32>
    %107 = arith.addf %106, %105 : vector<8x128xf32>
    %108 = arith.divf %106, %107 : vector<8x128xf32>
    %109 = vector.extract_strided_slice %108 {offsets = [0, 32], sizes = [8, 32], strides = [1, 1]} : vector<8x128xf32> to vector<8x32xf32>
    %110 = vector.extract_strided_slice %108 {offsets = [0, 64], sizes = [8, 32], strides = [1, 1]} : vector<8x128xf32> to vector<8x32xf32>
    %111 = vector.extract_strided_slice %108 {offsets = [0, 96], sizes = [8, 32], strides = [1, 1]} : vector<8x128xf32> to vector<8x32xf32>
    %112 = arith.mulf %110, %96 : vector<8x32xf32>
    %113 = arith.mulf %109, %103 : vector<8x32xf32>
    %114 = arith.addf %112, %113 : vector<8x32xf32>
    %115 = math.tanh %114 : vector<8x32xf32>
    %116 = arith.mulf %111, %115 : vector<8x32xf32>
    %117 = vector.extract_strided_slice %5 {offsets = [48, 0], sizes = [8, 128], strides = [1, 1]} : vector<64x128xf32> to vector<8x128xf32>
    %cst_21 = arith.constant dense<0.000000e+00> : vector<8x128xf32>
    %118 = tpu.matmul %116, %6, %cst_21 {dimension_numbers = #tpu.dot_dimension_numbers<[1], [0], [0], [1], [0, 0, 1, 1], [], []>} : vector<8x32xf32>, vector<32x128xf32>, vector<8x128xf32> -> vector<8x128xf32>
    %119 = arith.addf %117, %118 : vector<8x128xf32>
    %120 = vector.extract_strided_slice %119 {offsets = [0, 0], sizes = [8, 32], strides = [1, 1]} : vector<8x128xf32> to vector<8x32xf32>
    %121 = math.tanh %120 : vector<8x32xf32>
    %122 = arith.negf %119 : vector<8x128xf32>
    %123 = math.exp %122 : vector<8x128xf32>
    %cst_22 = arith.constant 1.000000e+00 : f32
    %124 = vector.broadcast %cst_22 : f32 to vector<8x128xf32>
    %125 = arith.addf %124, %123 : vector<8x128xf32>
    %126 = arith.divf %124, %125 : vector<8x128xf32>
    %127 = vector.extract_strided_slice %126 {offsets = [0, 32], sizes = [8, 32], strides = [1, 1]} : vector<8x128xf32> to vector<8x32xf32>
    %128 = vector.extract_strided_slice %126 {offsets = [0, 64], sizes = [8, 32], strides = [1, 1]} : vector<8x128xf32> to vector<8x32xf32>
    %129 = vector.extract_strided_slice %126 {offsets = [0, 96], sizes = [8, 32], strides = [1, 1]} : vector<8x128xf32> to vector<8x32xf32>
    %130 = arith.mulf %128, %114 : vector<8x32xf32>
    %131 = arith.mulf %127, %121 : vector<8x32xf32>
    %132 = arith.addf %130, %131 : vector<8x32xf32>
    %133 = math.tanh %132 : vector<8x32xf32>
    %134 = arith.mulf %129, %133 : vector<8x32xf32>
    %135 = vector.extract_strided_slice %5 {offsets = [56, 0], sizes = [8, 128], strides = [1, 1]} : vector<64x128xf32> to vector<8x128xf32>
    %cst_23 = arith.constant dense<0.000000e+00> : vector<8x128xf32>
    %136 = tpu.matmul %134, %6, %cst_23 {dimension_numbers = #tpu.dot_dimension_numbers<[1], [0], [0], [1], [0, 0, 1, 1], [], []>} : vector<8x32xf32>, vector<32x128xf32>, vector<8x128xf32> -> vector<8x128xf32>
    %137 = arith.addf %135, %136 : vector<8x128xf32>
    %138 = vector.extract_strided_slice %137 {offsets = [0, 0], sizes = [8, 32], strides = [1, 1]} : vector<8x128xf32> to vector<8x32xf32>
    %139 = math.tanh %138 : vector<8x32xf32>
    %140 = arith.negf %137 : vector<8x128xf32>
    %141 = math.exp %140 : vector<8x128xf32>
    %cst_24 = arith.constant 1.000000e+00 : f32
    %142 = vector.broadcast %cst_24 : f32 to vector<8x128xf32>
    %143 = arith.addf %142, %141 : vector<8x128xf32>
    %144 = arith.divf %142, %143 : vector<8x128xf32>
    %145 = vector.extract_strided_slice %144 {offsets = [0, 32], sizes = [8, 32], strides = [1, 1]} : vector<8x128xf32> to vector<8x32xf32>
    %146 = vector.extract_strided_slice %144 {offsets = [0, 64], sizes = [8, 32], strides = [1, 1]} : vector<8x128xf32> to vector<8x32xf32>
    %147 = vector.extract_strided_slice %144 {offsets = [0, 96], sizes = [8, 32], strides = [1, 1]} : vector<8x128xf32> to vector<8x32xf32>
    %148 = arith.mulf %146, %132 : vector<8x32xf32>
    %149 = arith.mulf %145, %139 : vector<8x32xf32>
    %150 = arith.addf %148, %149 : vector<8x32xf32>
    %151 = math.tanh %150 : vector<8x32xf32>
    %152 = arith.mulf %147, %151 : vector<8x32xf32>
    %c0_25 = arith.constant 0 : index
    %c0_26 = arith.constant 0 : index
    %153 = vector.load %arg4[%c0_25, %c0_26] : memref<32x128xf32, #tpu.memory_space<vmem>>, vector<32x128xf32>
    %cst_27 = arith.constant dense<0.000000e+00> : vector<8x128xf32>
    %154 = tpu.matmul %152, %153, %cst_27 {dimension_numbers = #tpu.dot_dimension_numbers<[1], [0], [0], [1], [0, 0, 1, 1], [], []>} : vector<8x32xf32>, vector<32x128xf32>, vector<8x128xf32> -> vector<8x128xf32>
    %c0_28 = arith.constant 0 : index
    %c0_29 = arith.constant 0 : index
    %155 = vector.load %arg5[%c0_28, %c0_29] : memref<1x128xf32, #tpu.memory_space<vmem>>, vector<1x128xf32>
    %156 = vector.broadcast %155 : vector<1x128xf32> to vector<8x128xf32>
    %157 = arith.addf %154, %156 : vector<8x128xf32>
    %c0_30 = arith.constant 0 : index
    %c0_31 = arith.constant 0 : index
    %158 = vector.load %arg6[%c0_30, %c0_31] : memref<8x128xf32, #tpu.memory_space<vmem>>, vector<8x128xf32>
    tpu.vector_store %arg6[%c0_30, %c0_31], %157 {strides = array<i32>} : memref<8x128xf32, #tpu.memory_space<vmem>>, vector<8x128xf32>,
    return
  }
}

</mosaic_0001>

<bundles_post_ra>
// kernel: tpu_custom_call.1
= control target key start
LH: loop header
LB: loop body
LE: loop exit
PB: predicated region body
PF: predicated region fallthrough
CT: control target
= control target key end

     0   :  { %vm41_vm0 = vcmask 130048   ;;  %v1422_v3 = vmov 0.0|0.0   ;;  %vm1423_vm1 = vmmov 0   ;;  %v1424_v10 = vmov 0.0   ;;  %s1661_s0 = inlined_call_operand.vmem [shape: f32[64,16], index: 0, kind: input, shape index: {}]   ;;  %s1662_s1 = inlined_call_operand.vmem [shape: f32[16,128], index: 1, kind: input, shape index: {}]   ;;  %s1663_s2 = inlined_call_operand.vmem [shape: f32[32,128], index: 2, kind: input, shape index: {}]   ;;  %s1664_s3 = inlined_call_operand.vmem [shape: f32[1,128], index: 3, kind: input, shape index: {}]   ;;  %s1665_s4 = inlined_call_operand.vmem [shape: f32[32,128], index: 4, kind: input, shape index: {}]   ;;  %s1666_s5 = inlined_call_operand.vmem [shape: f32[1,128], index: 5, kind: input, shape index: {}]   ;;  %s1667_s6 = inlined_call_operand.hbm [shape: f32[8,128], index: 6, kind: output, shape index: {}]  }
   0x1   :  { %v32_v0 = vld [vmem:[%s1662_s1] sm:$0xff]  ;;  %v33_v1 = vld [vmem:[%s1662_s1 + $0x8] sm:$0xff]  ;;  %1275 = vmatprep.subr.bf16.mxu1 %v1422_v3  ;;  %v173_v8 = vld [vmem:[%s1663_s2 + $0x10] sm:$0xff]  ;;  %1180 = vmatprep.mubr.msk.f32.mxu1 %vm1423_vm1, %v1424_v10 }
   0x2   :  { %v171_v2 = vld [vmem:[%s1663_s2] sm:$0xff]  ;;  %v1271_v4 = vpack.c.bf16 %v33_v1, %v32_v0  ;;  %v172_v5 = vld [vmem:[%s1663_s2 + $0x8] sm:$0xff]  ;;  %v174_v9 = vld [vmem:[%s1663_s2 + $0x18] sm:$0xff] }
   0x3   :  { %v24_v6 = vld [vmem:[%s1661_s0] sm:$0xff]  ;;  %v1478_v7 = vpack.c.bf16 %v172_v5, %v171_v2 }
   0x4   :  { %1160 = vmatprep.mubr.msk.f32.mxu0 %vm41_vm0, %v24_v6 }
   0x5   :  { %11 = vsyncpa [#allocation3], 0  ;;  %1272 = vmatprep.subr.bf16.mxu0 %v1271_v4  ;;  %1277 = vmatpush3.bf16.msra.mxu1 %v1478_v7  ;;  %v25_v11 = vld [vmem:[%s1661_s0 + $0x8] sm:$0xff]  ;;  %v1493_v12 = vpack.c.bf16 %v174_v9, %v173_v8  ;;  %v1514_v13 = vld [vmem:[%s1664_s3] ss:$0 sm:$0xff]  ;;  %s1425_s13 = smov 32  }
   0x6   :  { %1274 = vmatpush3.bf16.msra.mxu0 %v1271_v4  ;;  %1278 = vmatprep.subr.bf16.mxu1 %v1422_v3  ;;  %vm175_vm2 = vcmask 261120   ;;  %v26_v48 = vld [vmem:[%s1661_s0 + $0x10] sm:$0xff]  ;;  %v27_v49 = vld [vmem:[%s1661_s0 + $0x18] sm:$0xff]  ;;  %v28_v50 = vld [vmem:[%s1661_s0 + $0x20] sm:$0xff] }
   0x7   :  { %1287 = vmatprep.subr.bf16.mxu0 %v1422_v3  ;;  %v29_v51 = vld [vmem:[%s1661_s0 + $0x28] sm:$0xff]  ;;  %v30_v52 = vld [vmem:[%s1661_s0 + $0x30] sm:$0xff]  ;;  %v31_v53 = vld [vmem:[%s1661_s0 + $0x38] sm:$0xff] }
   0x9   :  { %1161 = vmatmul.mubr.msk.f32.vlgmr.msra.gmra.mrb[0].mxu0 %vm41_vm0, %v25_v11  ;;  %1280 = vmatpush3.bf16.msra.mxu1 %v1493_v12 }
   0xa   :  { %1289 = vmatpush3.bf16.msra.mxu0 %v1478_v7  ;;  %1281 = vmatprep.subr.bf16.mxu1 %v1422_v3 }
   0xb   :  { %1290 = vmatprep.subr.bf16.mxu0 %v1422_v3  ;;  %1163 = vmatprep.mubr.msk.f32.mxu0 %vm41_vm0, %v26_v48 }
   0xc   :  { %1181 = vmatmul.mubr.f32.vlgmr.msra.gmra.mrb[0].mxu1 %v1424_v10 }
   0xd   :  { %1283 = vmatpush3.bf16.msra.mxu1 %v1478_v7  ;;  %1191 = vmatprep.mubr.msk.f32.mxu1 %vm1423_vm1, %v1424_v10 }
   0xe   :  { %1284 = vmatprep.subr.bf16.mxu1 %v1422_v3  ;;  %1292 = vmatpush3.bf16.msra.mxu0 %v1493_v12 }
   0xf   :  { %1299 = vmatprep.subr.bf16.mxu0 %v1422_v3  ;;  %1164 = vmatmul.mubr.msk.f32.gmra.mrb[2].mxu0 %vm41_vm0, %v27_v49 }
  0x10   :  { %1166 = vmatprep.mubr.msk.f32.mxu0 %vm41_vm0, %v28_v50 }
  0x11   :  { %1286 = vmatpush3.bf16.msra.mxu1 %v1493_v12 }
  0x12   :  { %1293 = vmatprep.subr.bf16.mxu1 %v1422_v3 }
  0x13   :  { %1167 = vmatmul.mubr.msk.f32.gmra.mrb[4].mxu0 %vm41_vm0, %v29_v51 }
  0x14   :  { %1169 = vmatprep.mubr.msk.f32.mxu0 %vm41_vm0, %v30_v52 }
  0x17   :  { %1170 = vmatmul.mubr.msk.f32.gmra.mrb[6].mxu0 %vm41_vm0, %v31_v53 }
  0x18   :  { %1202 = vmatprep.mubr.msk.f32.mxu0 %vm1423_vm1, %v1424_v10 }
  0xdc   :  { %v1162_v14 = vpop.f32.mrb[0].mxu0 }
  0xdd   :  { %v132_v15 = vpop.f32.mrb[1].mxu0  ;;  %v138_v34 = vadd.f32 %v1162_v14, %v1514_v13 }
  0xde   :  { %v133_v16 = vadd.f32 %v1514_v13, %v132_v15 }
  0xdf   :  { %v245_v17 = vpop.f32.mrb[0].mxu1 }
  0xe0   :  { %v249_v18 = vadd.f32 %v245_v17, %v133_v16  ;;  %v1182_v19 = vpop.f32.mrb[1].mxu1 }
  0xe2   :  { %1334 = vtanh.f32 %v249_v18  ;;  %v1084_v21 = vmul.f32 -1.442695, %v249_v18  ;;  %v1165_v57 = vpop.f32.mrb[2].mxu0 }
  0xe3   :  { %v142_v58 = vpop.f32.mrb[3].mxu0 }
  0xe4   :  { %1336 = vpow2.f32 %v1084_v21  ;;  %v143_v0 = vadd.f32 %v1514_v13, %v142_v58 }
  0xe6   :  { %v1559_v59 = vpop.f32.mrb[4].mxu0 }
  0xe7   :  { %v1561_v60 = vpop.f32.mrb[5].mxu0 }
  0xea   :  { %v1563_v61 = vpop.f32.mrb[6].mxu0 }
  0xeb   :  { %v1565_v62 = vpop.f32.mrb[7].mxu0 }
  0xec   :  { %v1335_v20 = vpop.eup %1334 }
  0xed   :  { %259 = vrot.lane.b32.xlu0 %v1335_v20, %s1425_s13 }
  0xee   :  { %v1337_v22 = vpop.eup %1336 }
  0xef   :  { %v254_v23 = vadd.f32 1.0, %v1337_v22 }
  0xf1   :  { %1338 = vrcp.f32 %v254_v23  ;;  %v148_v23 = vadd.f32 %v1165_v57, %v1514_v13 }
  0xfb   :  { %v1339_v24 = vpop.eup %1338 }
  0xfc   :  { %v257_v27 = vmul.f32 0.0, %v1339_v24 }
 0x15f   :  { %v260_v25 = vpop.permute.xlu0 %259 }
 0x160   :  { %v262_v26 = vmul.f32 %v1339_v24, %v260_v25 }
 0x162   :  { %264 = vrot.lane.b32.xlu0 %v262_v26, %s1425_s13 }
 0x1d4   :  { %v265_v28 = vpop.permute.xlu0 %264 }
 0x1d5   :  { %v267_v29 = vadd.f32 %v265_v28, %v257_v27 }
 0x1d7   :  { %1340 = vtanh.f32 %v267_v29 }
 0x1e1   :  { %v1341_v30 = vpop.eup %1340 }
 0x1e2   :  { %270 = vrot.lane.b32.xlu1 %v1341_v30, %s1425_s13 }
 0x254   :  { %v271_v31 = vpop.permute.xlu1 %270 }
 0x255   :  { %v273_v32 = vmul.f32 %v1339_v24, %v271_v31 }
 0x257   :  { %275 = vrot.lane.b32.xlu1 %v273_v32, %s1425_s13 }
 0x2c9   :  { %v276_v33 = vpop.permute.xlu1 %275 }
 0x2ca   :  { %1192 = vmatmul.mubr.msk.f32.vlgmr.msra.gmra.mrb[2].mxu1 %vm175_vm2, %v276_v33 }
 0x2cb   :  { %1295 = vmatpush3.bf16.msra.mxu1 %v1478_v7  ;;  %1213 = vmatprep.mubr.msk.f32.mxu1 %vm1423_vm1, %v1424_v10 }
 0x2cc   :  { %1296 = vmatprep.subr.bf16.mxu1 %v1422_v3 }
 0x2cf   :  { %1298 = vmatpush3.bf16.msra.mxu1 %v1493_v12 }
 0x2d0   :  { %1305 = vmatprep.subr.bf16.mxu1 %v1422_v3 }
 0x39d   :  { %v345_v35 = vpop.f32.mrb[2].mxu1 }
 0x39e   :  { %v349_v36 = vadd.f32 %v345_v35, %v138_v34  ;;  %v1193_v37 = vpop.f32.mrb[3].mxu1 }
 0x3a0   :  { %1342 = vtanh.f32 %v349_v36  ;;  %v1086_v39 = vmul.f32 -1.442695, %v349_v36 }
 0x3a2   :  { %1344 = vpow2.f32 %v1086_v39 }
 0x3aa   :  { %v1343_v38 = vpop.eup %1342 }
 0x3ab   :  { %359 = vrot.lane.b32.xlu0 %v1343_v38, %s1425_s13 }
 0x3ac   :  { %v1345_v40 = vpop.eup %1344 }
 0x3ad   :  { %v354_v41 = vadd.f32 1.0, %v1345_v40 }
 0x3af   :  { %1346 = vrcp.f32 %v354_v41  ;;  %v153_v41 = vadd.f32 %v1514_v13, %v1561_v60  ;;  %v158_v60 = vadd.f32 %v1559_v59, %v1514_v13 }
 0x3b9   :  { %v1347_v42 = vpop.eup %1346 }
 0x3ba   :  { %v357_v45 = vmul.f32 %v1347_v42, %v267_v29 }
 0x41d   :  { %v360_v43 = vpop.permute.xlu0 %359 }
 0x41e   :  { %v362_v44 = vmul.f32 %v1347_v42, %v360_v43 }
 0x420   :  { %364 = vrot.lane.b32.xlu1 %v362_v44, %s1425_s13 }
 0x492   :  { %v365_v46 = vpop.permute.xlu1 %364 }
 0x493   :  { %v367_v47 = vadd.f32 %v365_v46, %v357_v45 }
 0x495   :  { %1348 = vtanh.f32 %v367_v47 }
 0x49f   :  { %v1349_v54 = vpop.eup %1348 }
 0x4a0   :  { %370 = vrot.lane.b32.xlu0 %v1349_v54, %s1425_s13 }
 0x512   :  { %v371_v55 = vpop.permute.xlu0 %370 }
 0x513   :  { %v373_v56 = vmul.f32 %v1347_v42, %v371_v55 }
 0x515   :  { %375 = vrot.lane.b32.xlu1 %v373_v56, %s1425_s13 }
 0x587   :  { %v376_v63 = vpop.permute.xlu1 %375 }
 0x588   :  { %1203 = vmatmul.mubr.msk.f32.vlgmr.msra.gmra.mrb[8].mxu0 %vm175_vm2, %v376_v63 }
 0x589   :  { %1301 = vmatpush3.bf16.msra.mxu0 %v1478_v7  ;;  %1224 = vmatprep.mubr.msk.f32.mxu0 %vm1423_vm1, %v1424_v10 }
 0x58a   :  { %1302 = vmatprep.subr.bf16.mxu0 %v1422_v3 }
 0x58d   :  { %1304 = vmatpush3.bf16.msra.mxu0 %v1493_v12 }
 0x58e   :  { %1311 = vmatprep.subr.bf16.mxu0 %v1422_v3 }
 0x65b   :  { %v445_v1 = vpop.f32.mrb[8].mxu0 }
 0x65c   :  { %v449_v2 = vadd.f32 %v445_v1, %v143_v0  ;;  %v1204_v4 = vpop.f32.mrb[9].mxu0 }
 0x65e   :  { %1350 = vtanh.f32 %v449_v2  ;;  %v1088_v6 = vmul.f32 -1.442695, %v449_v2 }
 0x660   :  { %1352 = vpow2.f32 %v1088_v6 }
 0x668   :  { %v1351_v5 = vpop.eup %1350 }
 0x669   :  { %459 = vrot.lane.b32.xlu0 %v1351_v5, %s1425_s13 }
 0x66a   :  { %v1353_v8 = vpop.eup %1352 }
 0x66b   :  { %v454_v9 = vadd.f32 1.0, %v1353_v8 }
 0x66d   :  { %1354 = vrcp.f32 %v454_v9 }
 0x677   :  { %v1355_v11 = vpop.eup %1354 }
 0x678   :  { %v457_v16 = vmul.f32 %v1355_v11, %v367_v47 }
 0x6db   :  { %v460_v14 = vpop.permute.xlu0 %459 }
 0x6dc   :  { %v462_v15 = vmul.f32 %v1355_v11, %v460_v14 }
 0x6de   :  { %464 = vrot.lane.b32.xlu1 %v462_v15, %s1425_s13 }
 0x750   :  { %v465_v17 = vpop.permute.xlu1 %464 }
 0x751   :  { %v467_v18 = vadd.f32 %v465_v17, %v457_v16 }
 0x753   :  { %1356 = vtanh.f32 %v467_v18 }
 0x75d   :  { %v1357_v19 = vpop.eup %1356 }
 0x75e   :  { %470 = vrot.lane.b32.xlu0 %v1357_v19, %s1425_s13 }
 0x7d0   :  { %v471_v20 = vpop.permute.xlu0 %470 }
 0x7d1   :  { %v473_v21 = vmul.f32 %v1355_v11, %v471_v20 }
 0x7d3   :  { %475 = vrot.lane.b32.xlu1 %v473_v21, %s1425_s13 }
 0x845   :  { %v476_v22 = vpop.permute.xlu1 %475 }
 0x846   :  { %1214 = vmatmul.mubr.msk.f32.vlgmr.msra.gmra.mrb[4].mxu1 %vm175_vm2, %v476_v22 }
 0x847   :  { %1307 = vmatpush3.bf16.msra.mxu1 %v1478_v7  ;;  %1235 = vmatprep.mubr.msk.f32.mxu1 %vm1423_vm1, %v1424_v10 }
 0x848   :  { %1308 = vmatprep.subr.bf16.mxu1 %v1422_v3 }
 0x84b   :  { %1310 = vmatpush3.bf16.msra.mxu1 %v1493_v12 }
 0x84c   :  { %1317 = vmatprep.subr.bf16.mxu1 %v1422_v3 }
 0x919   :  { %v545_v24 = vpop.f32.mrb[4].mxu1 }
 0x91a   :  { %v549_v25 = vadd.f32 %v545_v24, %v148_v23  ;;  %v1215_v26 = vpop.f32.mrb[5].mxu1 }
 0x91c   :  { %1358 = vtanh.f32 %v549_v25  ;;  %v1090_v28 = vmul.f32 -1.442695, %v549_v25 }
 0x91e   :  { %1360 = vpow2.f32 %v1090_v28 }
 0x926   :  { %v1359_v27 = vpop.eup %1358 }
 0x927   :  { %559 = vrot.lane.b32.xlu0 %v1359_v27, %s1425_s13 }
 0x928   :  { %v1361_v29 = vpop.eup %1360 }
 0x929   :  { %v554_v30 = vadd.f32 1.0, %v1361_v29 }
 0x92b   :  { %1362 = vrcp.f32 %v554_v30 }
 0x935   :  { %v1363_v31 = vpop.eup %1362 }
 0x936   :  { %v557_v34 = vmul.f32 %v1363_v31, %v467_v18  ;;  %v163_v18 = vadd.f32 %v1514_v13, %v1565_v62 }
 0x999   :  { %v560_v32 = vpop.permute.xlu0 %559 }
 0x99a   :  { %v562_v33 = vmul.f32 %v1363_v31, %v560_v32 }
 0x99c   :  { %564 = vrot.lane.b32.xlu1 %v562_v33, %s1425_s13 }
 0xa0e   :  { %v565_v35 = vpop.permute.xlu1 %564 }
 0xa0f   :  { %v567_v36 = vadd.f32 %v565_v35, %v557_v34  ;;  %v168_v34 = vadd.f32 %v1563_v61, %v1514_v13  ;;  %v974_v61 = vld [vmem:[%s1665_s4] sm:$0xff] }
 0xa11   :  { %1364 = vtanh.f32 %v567_v36 }
 0xa1b   :  { %v1365_v37 = vpop.eup %1364 }
 0xa1c   :  { %570 = vrot.lane.b32.xlu0 %v1365_v37, %s1425_s13 }
 0xa8e   :  { %v571_v38 = vpop.permute.xlu0 %570 }
 0xa8f   :  { %v573_v39 = vmul.f32 %v1363_v31, %v571_v38 }
 0xa91   :  { %575 = vrot.lane.b32.xlu1 %v573_v39, %s1425_s13 }
 0xb03   :  { %v576_v40 = vpop.permute.xlu1 %575 }
 0xb04   :  { %1225 = vmatmul.mubr.msk.f32.vlgmr.msra.gmra.mrb[10].mxu0 %vm175_vm2, %v576_v40 }
 0xb05   :  { %1313 = vmatpush3.bf16.msra.mxu0 %v1478_v7  ;;  %1246 = vmatprep.mubr.msk.f32.mxu0 %vm1423_vm1, %v1424_v10 }
 0xb06   :  { %1314 = vmatprep.subr.bf16.mxu0 %v1422_v3 }
 0xb09   :  { %1316 = vmatpush3.bf16.msra.mxu0 %v1493_v12 }
 0xb0a   :  { %1323 = vmatprep.subr.bf16.mxu0 %v1422_v3 }
 0xbd7   :  { %v645_v42 = vpop.f32.mrb[10].mxu0 }
 0xbd8   :  { %v649_v43 = vadd.f32 %v645_v42, %v153_v41  ;;  %v1226_v44 = vpop.f32.mrb[11].mxu0 }
 0xbda   :  { %1366 = vtanh.f32 %v649_v43  ;;  %v1092_v46 = vmul.f32 -1.442695, %v649_v43 }
 0xbdc   :  { %1368 = vpow2.f32 %v1092_v46 }
 0xbe4   :  { %v1367_v45 = vpop.eup %1366 }
 0xbe5   :  { %659 = vrot.lane.b32.xlu0 %v1367_v45, %s1425_s13 }
 0xbe6   :  { %v1369_v47 = vpop.eup %1368 }
 0xbe7   :  { %v654_v48 = vadd.f32 1.0, %v1369_v47  ;;  %v975_v47 = vld [vmem:[%s1665_s4 + $0x8] sm:$0xff] }
 0xbe9   :  { %1370 = vrcp.f32 %v654_v48  ;;  %v976_v48 = vld [vmem:[%s1665_s4 + $0x10] sm:$0xff] }
 0xbf3   :  { %v1371_v49 = vpop.eup %1370 }
 0xbf4   :  { %v657_v52 = vmul.f32 %v1371_v49, %v567_v36 }
 0xc57   :  { %v660_v50 = vpop.permute.xlu0 %659 }
 0xc58   :  { %v662_v51 = vmul.f32 %v1371_v49, %v660_v50  ;;  %v977_v50 = vld [vmem:[%s1665_s4 + $0x18] sm:$0xff]  ;;  %s1426_s4 = smov [#allocation2]  }
 0xc59   :  { %s1067_s9 = sshll.u32 %s1426_s4, 4  ;;  %s1068_s9 = int_to_ptr.vmem [resolvable:$true] %s1067_s9 }
 0xc5a   :  { %664 = vrot.lane.b32.xlu1 %v662_v51, %s1425_s13  ;;  %v1327_v51 = vpack.c.bf16 %v977_v50, %v976_v48  ;;  %s1398_s10 = scalar_lea.vmem %s1068_s9, 128  ;;  %p1403_p1 = scmp.lt.s32.totalorder %s1068_s9, %s1068_s9 }
 0xc5b   :  { %p1399_p0 = scmp.ne.s32.totalorder %s1068_s9, %s1398_s10  ;;  %p1404_p2 = scmp.lt.s32.totalorder %s1398_s10, %s1398_s10 }
 0xc5d   :  { %p1405_p3 = por %p1404_p2, %p1403_p1 }
 0xc5f   :  { %p1406_p4 = pnand %p1405_p3, %p1399_p0 }
 0xccc   :  { %v665_v53 = vpop.permute.xlu1 %664 }
 0xccd   :  { %v667_v54 = vadd.f32 %v665_v53, %v657_v52 }
 0xccf   :  { %1372 = vtanh.f32 %v667_v54 }
 0xcd9   :  { %v1373_v55 = vpop.eup %1372 }
 0xcda   :  { %670 = vrot.lane.b32.xlu0 %v1373_v55, %s1425_s13 }
 0xd4c   :  { %v671_v56 = vpop.permute.xlu0 %670 }
 0xd4d   :  { %v673_v57 = vmul.f32 %v1371_v49, %v671_v56  ;;  %v1324_v49 = vpack.c.bf16 %v975_v47, %v974_v61  ;;  %v1099_v56 = vld [vmem:[%s1666_s5] ss:$0 sm:$0xff] }
 0xd4f   :  { %675 = vrot.lane.b32.xlu1 %v673_v57, %s1425_s13 }
 0xdc1   :  { %v676_v58 = vpop.permute.xlu1 %675 }
 0xdc2   :  { %1236 = vmatmul.mubr.msk.f32.vlgmr.msra.gmra.mrb[6].mxu1 %vm175_vm2, %v676_v58 }
 0xdc3   :  { %1319 = vmatpush3.bf16.msra.mxu1 %v1478_v7  ;;  %1257 = vmatprep.mubr.msk.f32.mxu1 %vm1423_vm1, %v1424_v10 }
 0xdc4   :  { %1320 = vmatprep.subr.bf16.mxu1 %v1422_v3 }
 0xdc7   :  { %1322 = vmatpush3.bf16.msra.mxu1 %v1493_v12 }
 0xe95   :  { %v745_v63 = vpop.f32.mrb[6].mxu1 }
 0xe96   :  { %v749_v0 = vadd.f32 %v745_v63, %v158_v60  ;;  %v1237_v1 = vpop.f32.mrb[7].mxu1 }
 0xe98   :  { %1374 = vtanh.f32 %v749_v0  ;;  %v1094_v4 = vmul.f32 -1.442695, %v749_v0 }
 0xe9a   :  { %1376 = vpow2.f32 %v1094_v4 }
 0xea2   :  { %v1375_v2 = vpop.eup %1374 }
 0xea3   :  { %759 = vrot.lane.b32.xlu0 %v1375_v2, %s1425_s13 }
 0xea4   :  { %v1377_v7 = vpop.eup %1376 }
 0xea5   :  { %v754_v5 = vadd.f32 1.0, %v1377_v7 }
 0xea7   :  { %1378 = vrcp.f32 %v754_v5 }
 0xeb1   :  { %v1379_v6 = vpop.eup %1378 }
 0xeb2   :  { %v757_v12 = vmul.f32 %v1379_v6, %v667_v54 }
 0xf15   :  { %v760_v8 = vpop.permute.xlu0 %759 }
 0xf16   :  { %v762_v9 = vmul.f32 %v1379_v6, %v760_v8 }
 0xf18   :  { %764 = vrot.lane.b32.xlu1 %v762_v9, %s1425_s13 }
 0xf8a   :  { %v765_v11 = vpop.permute.xlu1 %764 }
 0xf8b   :  { %v767_v59 = vadd.f32 %v765_v11, %v757_v12 }
 0xf8d   :  { %1380 = vtanh.f32 %v767_v59 }
 0xf97   :  { %v1381_v14 = vpop.eup %1380 }
 0xf98   :  { %770 = vrot.lane.b32.xlu0 %v1381_v14, %s1425_s13 }
0x100a   :  { %v771_v15 = vpop.permute.xlu0 %770 }
0x100b   :  { %v773_v16 = vmul.f32 %v1379_v6, %v771_v15 }
0x100d   :  { %775 = vrot.lane.b32.xlu1 %v773_v16, %s1425_s13 }
0x107f   :  { %v776_v17 = vpop.permute.xlu1 %775 }
0x1080   :  { %1247 = vmatmul.mubr.msk.f32.vlgmr.msra.gmra.mrb[12].mxu0 %vm175_vm2, %v776_v17 }
0x1081   :  { %1268 = vmatprep.mubr.msk.f32.mxu0 %vm1423_vm1, %v1424_v10  ;;  %1325 = vmatpush3.bf16.msra.mxu0 %v1324_v49 }
0x1082   :  { %1326 = vmatprep.subr.bf16.mxu0 %v1422_v3 }
0x1085   :  { %1328 = vmatpush3.bf16.msra.mxu0 %v1327_v51 }
0x1153   :  { %v845_v19 = vpop.f32.mrb[12].mxu0 }
0x1154   :  { %v849_v20 = vadd.f32 %v845_v19, %v163_v18  ;;  %v1248_v21 = vpop.f32.mrb[13].mxu0 }
0x1156   :  { %1382 = vtanh.f32 %v849_v20  ;;  %v1096_v23 = vmul.f32 -1.442695, %v849_v20 }
0x1158   :  { %1384 = vpow2.f32 %v1096_v23 }
0x1160   :  { %v1383_v22 = vpop.eup %1382 }
0x1161   :  { %859 = vrot.lane.b32.xlu0 %v1383_v22, %s1425_s13 }
0x1162   :  { %v1385_v24 = vpop.eup %1384 }
0x1163   :  { %v854_v25 = vadd.f32 1.0, %v1385_v24 }
0x1165   :  { %1386 = vrcp.f32 %v854_v25 }
0x116f   :  { %v1387_v26 = vpop.eup %1386 }
0x1170   :  { %v857_v10 = vmul.f32 %v1387_v26, %v767_v59 }
0x11d3   :  { %v860_v27 = vpop.permute.xlu0 %859 }
0x11d4   :  { %v862_v28 = vmul.f32 %v1387_v26, %v860_v27 }
0x11d6   :  { %864 = vrot.lane.b32.xlu1 %v862_v28, %s1425_s13 }
0x1248   :  { %v865_v29 = vpop.permute.xlu1 %864 }
0x1249   :  { %v867_v62 = vadd.f32 %v865_v29, %v857_v10 }
0x124b   :  { %1388 = vtanh.f32 %v867_v62 }
0x1255   :  { %v1389_v30 = vpop.eup %1388 }
0x1256   :  { %870 = vrot.lane.b32.xlu0 %v1389_v30, %s1425_s13 }
0x12c8   :  { %v871_v31 = vpop.permute.xlu0 %870 }
0x12c9   :  { %v873_v32 = vmul.f32 %v1387_v26, %v871_v31 }
0x12cb   :  { %875 = vrot.lane.b32.xlu1 %v873_v32, %s1425_s13 }
0x133d   :  { %v876_v33 = vpop.permute.xlu1 %875 }
0x133e   :  { %1258 = vmatmul.mubr.msk.f32.vlgmr.msra.gmra.mrb[8].mxu1 %vm175_vm2, %v876_v33 }
0x1411   :  { %v945_v35 = vpop.f32.mrb[8].mxu1 }
0x1412   :  { %v949_v36 = vadd.f32 %v945_v35, %v168_v34  ;;  %v1259_v37 = vpop.f32.mrb[9].mxu1 }
0x1414   :  { %1390 = vtanh.f32 %v949_v36  ;;  %v1098_v39 = vmul.f32 -1.442695, %v949_v36 }
0x1416   :  { %1392 = vpow2.f32 %v1098_v39 }
0x141e   :  { %v1391_v38 = vpop.eup %1390 }
0x141f   :  { %959 = vrot.lane.b32.xlu0 %v1391_v38, %s1425_s13 }
0x1420   :  { %v1393_v40 = vpop.eup %1392 }
0x1421   :  { %v954_v41 = vadd.f32 1.0, %v1393_v40 }
0x1423   :  { %1394 = vrcp.f32 %v954_v41 }
0x142d   :  { %v1395_v42 = vpop.eup %1394 }
0x142e   :  { %v957_v45 = vmul.f32 %v1395_v42, %v867_v62 }
0x1491   :  { %v960_v43 = vpop.permute.xlu0 %959 }
0x1492   :  { %v962_v44 = vmul.f32 %v1395_v42, %v960_v43 }
0x1494   :  { %964 = vrot.lane.b32.xlu1 %v962_v44, %s1425_s13 }
0x1506   :  { %v965_v46 = vpop.permute.xlu1 %964 }
0x1507   :  { %v967_v13 = vadd.f32 %v965_v46, %v957_v45 }
0x1509   :  { %1396 = vtanh.f32 %v967_v13 }
0x1513   :  { %v1397_v52 = vpop.eup %1396 }
0x1514   :  { %970 = vrot.lane.b32.xlu0 %v1397_v52, %s1425_s13 }
0x1586   :  { %v971_v53 = vpop.permute.xlu0 %970 }
0x1587   :  { %v973_v54 = vmul.f32 %v1395_v42, %v971_v53 }
0x1589   :  { %986 = vrot.lane.b32.xlu1 %v973_v54, %s1425_s13 }
0x15fb   :  { %v987_v55 = vpop.permute.xlu1 %986 }
0x15fc   :  { %1269 = vmatmul.mubr.msk.f32.vlgmr.msra.gmra.mrb[14].mxu0 %vm175_vm2, %v987_v55 }
0x16cf   :  { %v1056_v57 = vpop.f32.mrb[14].mxu0 }
0x16d0   :  { %v1057_v58 = vadd.f32 %v1099_v56, %v1056_v57  ;;  %v1270_v3 = vpop.f32.mrb[15].mxu0 }
0x16d2   :  { %1060 = vst [vmem:[#allocation2] sm:$0xff] %v1057_v58 }
0x16d3   :  { %1409 = shalt.err (!%p1406_p4)
}
0x16d4   :  { %s1410_s12 = scalar_lea.hbm %s1667_s6, 128 }
0x16d5   :  { %p1411_p5 = scmp.ne.s32.totalorder %s1667_s6, %s1410_s12  ;;  %p1414_p6 = scmp.lt.u32.totalorder %s1410_s12, %s1667_s6 }
0x16d7   :  { %p1416_p7 = pnand %p1414_p6, %p1411_p5 }
0x16d9   :  { %1419 = shalt.err (!%p1416_p7)
}
0x16da   :  { %1070 = dma.vmem_to_hbm [thread:$0]  %s1068_s9, 128, %s1667_s6, [#allocation3]  }
0x16db   :  { %1420 = dma.done.wait [#allocation3], 128  }
0x16dc   :  { %1421 = vsyncadd [#allocation3], 4294967168 }
0x16dd   :  { %1074 = vsyncpa [#allocation3], 1 }

</bundles_post_ra>
